<compile_context>
chip_gen: v6e
topology: v6e:2x2x1
jax: 0.10.0
libtpu: 0.0.40
codegen_flags: <defaults>
</compile_context>

<pallas_src>
import functools
import math

import jax
import jax.numpy as jnp
from jax import lax
from jax.experimental import pallas as pl
from jax.experimental.pallas import tpu as pltpu


def _block_spec(shape, index_map, buffer_count=None):
    """BlockSpec with optional pipeline-depth override; falls back if unsupported."""
    if buffer_count is not None and hasattr(pl, "Buffered"):
        try:
            return pl.BlockSpec(shape, index_map, pipeline_mode=pl.Buffered(buffer_count))
        except TypeError:
            pass
    return pl.BlockSpec(shape, index_map)


def _abmil_sb_kernel(x_ref, wp_ref, bp_ref, kq_ref,
                     proj_ref, attn_ref, pooled_ref,
                     m_ref, l_ref, acc_ref, mchunk_ref,
                     *, block_n, n_valid, n_pad, n_chunks):
    """Grid = (bag b [parallel], instance-chunk j [arbitrary])."""
    j = pl.program_id(1)

    @pl.when(j == 0)
    def _init():
        m_ref[...] = jnp.full(m_ref.shape, -jnp.inf, jnp.float32)
        l_ref[...] = jnp.zeros(l_ref.shape, jnp.float32)
        acc_ref[...] = jnp.zeros(acc_ref.shape, jnp.float32)

    # ---- input projection + ReLU (Dropout is identity at inference) ----
    # MXU in compute dtype (bf16 by default), f32 accumulation; bias/ReLU in f32.
    x = x_ref[0]                                                   # (block_n, Din)
    proj_f32 = jnp.dot(x, wp_ref[...], preferred_element_type=jnp.float32)
    proj_f32 = jnp.maximum(proj_f32 + bp_ref[...], 0.0)           # (block_n, H) f32
    proj_ref[0] = proj_f32.astype(proj_ref.dtype)
    proj_c = proj_f32.astype(x.dtype)                              # MXU-facing dtype

    # ---- class-attention scores for this chunk (K projection folded away) ----
    # s = (scale * q Wk^T) . proj^T : contract on H of both operands.  This is the
    # canonical flash-attention q.k^T pattern; Mosaic feeds the MXU with a transposed
    # weight load here -- no per-chunk (block_n, H) XLU transpose is emitted.
    s_row = lax.dot_general(kq_ref[...], proj_c,
                            dimension_numbers=(((1,), (1,)), ((), ())),
                            preferred_element_type=jnp.float32)    # (1, block_n)

    if n_valid < n_pad:  # static: mask zero-padded instances (tail chunk only ever
        # contains padding; the select is a few VPU ops/chunk against VALU slack,
        # so it is left unconditional rather than duplicating the body under pl.when).
        col = j * block_n + lax.broadcasted_iota(jnp.int32, (1, block_n), 1)
        s_row = jnp.where(col < n_valid, s_row, -1e30)

    # ---- online softmax accumulation of pooled = softmax(s) @ proj ----
    m_old = m_ref[...]                                             # (1, 1)
    m_new = jnp.maximum(m_old, jnp.max(s_row, axis=-1, keepdims=True))
    alpha = jnp.exp(m_old - m_new)
    p = jnp.exp(s_row - m_new)                                     # (1, block_n); pads -> 0
    l_ref[...] = alpha * l_ref[...] + jnp.sum(p, axis=-1, keepdims=True)
    acc_ref[...] = alpha * acc_ref[...] + jnp.dot(
        p.astype(proj_c.dtype), proj_c, preferred_element_type=jnp.float32)
    m_ref[...] = m_new

    # Store the already-exp'd chunk (steady-state EUP work) plus its shift so the
    # finalize tail only multiplies -- no full-row re-exp on the last chunk.
    mchunk_ref[pl.ds(j, 1), :] = m_new
    off = pl.multiple_of(j * block_n, block_n)
    attn_ref[0, :, pl.ds(off, block_n)] = p

    @pl.when(j == n_chunks - 1)
    def _finalize():
        # exact reciprocal: attention_scores are a user-visible output
        inv_l = pl.reciprocal(l_ref[...], approx=False)            # (1, 1)
        m_fin = m_ref[...]                                         # (1, 1)

        def _rescale(jj, carry):
            mj = mchunk_ref[pl.ds(jj, 1), :]                       # (1, 1)
            scale = jnp.exp(mj - m_fin) * inv_l
            o = pl.multiple_of(jj * block_n, block_n)
            attn_ref[0, :, pl.ds(o, block_n)] = (
                attn_ref[0, :, pl.ds(o, block_n)] * scale)
            return carry

        lax.fori_loop(0, n_chunks, _rescale, 0, unroll=n_chunks <= 8)
        pooled_ref[0] = (acc_ref[...] * inv_l).astype(pooled_ref.dtype)


def abmil_sb_forward(features, params, *, block_n=1024,
                     compute_dtype=jnp.bfloat16, proj_dtype=jnp.float32,
                     feature_buffers=2):
    """features: (B, N, Din). Returns (logits (B,C), attn (B,N), proj (B,N,H))."""
    B, N, Din = features.shape
    H = params["wp"].shape[1]
    C = params["wc"].shape[1]

    # ---- host-side algebraic folds (everything independent of `features`) ----
    scale = 1.0 / math.sqrt(H)
    q = params["class_token"] @ params["wq"] + params["bq"]        # (1, H)
    kq = (scale * (q @ params["wk"].T)).astype(compute_dtype)      # (1, H); q.bk^T dropped
    w_fused = params["wv"] @ params["wo"] @ params["wc"]           # (H, C)
    b_fused = (params["bv"] @ params["wo"] + params["bo"]) @ params["wc"] + params["bc"]

    # ---- instance-dim tiling (zero-pad + mask when N % block_n != 0) ----
    if N <= block_n:
        block_n_eff, n_pad = N, N
    else:
        block_n_eff = block_n
        n_pad = pl.cdiv(N, block_n_eff) * block_n_eff
    nc = n_pad // block_n_eff

    x = features.astype(compute_dtype)
    if n_pad != N:
        x = jnp.pad(x, ((0, 0), (0, n_pad - N), (0, 0)))
    wp = params["wp"].astype(compute_dtype)
    bp = params["bp"].astype(jnp.float32)      # elementwise math stays f32 (v5e VPU)

    kernel = functools.partial(_abmil_sb_kernel, block_n=block_n_eff,
                               n_valid=N, n_pad=n_pad, n_chunks=nc)

    # ---- VMEM budget: sum(block_bytes * buffer_count) + scratch + headroom,
    #      capped generation-aware (v7x physical VMEM is only 64 MiB). ----
    cbytes = jnp.dtype(compute_dtype).itemsize
    pbytes = jnp.dtype(proj_dtype).itemsize

    def _padded(r, c, itemsize):
        return (-(-r // 8) * 8) * (-(-c // 128) * 128) * itemsize

    budget = (
        max(feature_buffers, 2) * _padded(block_n_eff, Din, cbytes)  # streamed x tiles
        + 2 * _padded(Din, H, cbytes)          # Wp (counted at 2 in case Buffered(1) falls back)
        + 2 * _padded(1, H, 4) + 2 * _padded(1, H, cbytes)           # bp, kq
        + 2 * _padded(block_n_eff, H, pbytes)                        # proj output tiles
        + 2 * _padded(1, n_pad, 4)                                   # resident attn row
        + 2 * _padded(1, H, 4)                                       # pooled
        + _padded(nc, 1, 4) + 3 * _padded(1, H, 4)                   # scratch
        + (8 << 20))                                                 # compiler headroom
    try:
        vmem_cap = int(pltpu.get_tpu_info().vmem_capacity_bytes) * 3 // 4
    except Exception:
        vmem_cap = (64 << 20) * 3 // 4          # conservative: v7x per-core VMEM
    vmem_limit = min(int(budget), vmem_cap)

    feat_buf = feature_buffers if feature_buffers != 2 else None

    grid_spec = pltpu.PrefetchScalarGridSpec(
        num_scalar_prefetch=0,
        grid=(B, nc),
        in_specs=[
            _block_spec((1, block_n_eff, Din), lambda b, j: (b, j, 0), feat_buf),  # x chunk
            _block_spec((Din, H), lambda b, j: (0, 0), 1),                         # Wp (const)
            _block_spec((1, H), lambda b, j: (0, 0), 1),                           # bp (const)
            _block_spec((1, H), lambda b, j: (0, 0), 1),                           # kq (const)
        ],
        out_specs=[
            pl.BlockSpec((1, block_n_eff, H), lambda b, j: (b, j, 0)),   # projected feats
            pl.BlockSpec((1, 1, n_pad), lambda b, j: (b, 0, 0)),         # attention scores
            pl.BlockSpec((1, 1, H), lambda b, j: (b, 0, 0)),             # pooled = attn@proj
        ],
        scratch_shapes=[
            pltpu.VMEM((1, 1), jnp.float32),    # running max
            pltpu.VMEM((1, 1), jnp.float32),    # running sum-exp
            pltpu.VMEM((1, H), jnp.float32),    # running sum-exp * proj
            pltpu.VMEM((nc, 1), jnp.float32),   # per-chunk running max (finalize rescale)
        ],
    )

    proj, attn, pooled = pl.pallas_call(
        kernel,
        grid_spec=grid_spec,
        out_shape=(
            jax.ShapeDtypeStruct((B, n_pad, H), proj_dtype),
            jax.ShapeDtypeStruct((B, 1, n_pad), jnp.float32),
            jax.ShapeDtypeStruct((B, 1, H), jnp.float32),
        ),
        compiler_params=pltpu.CompilerParams(
            dimension_semantics=("parallel", "arbitrary"),
            vmem_limit_bytes=vmem_limit),
    )(x, wp, bp, kq)

    # Tiny fused classifier stays in XLA: one batched, lane-dense (B,H)@(H,C) matmul.
    pooled = pooled.reshape(B, H).astype(jnp.float32)
    logits = (pooled @ w_fused + b_fused).reshape(B, C)   # matches .view(-1, n_classes)
    attn = attn.reshape(B, n_pad)[:, :N]
    proj = proj[:, :N, :]
    return logits, attn, proj


def reference_forward(features, params):
    """Unfused, straightforward reference (validates the algebraic folds)."""
    q = params["class_token"] @ params["wq"] + params["bq"]
    proj = jnp.maximum(features @ params["wp"] + params["bp"], 0.0)
    k = proj @ params["wk"] + params["bk"]
    v = proj @ params["wv"] + params["bv"]
    s = jnp.einsum("qh,bnh->bqn", q, k) / jnp.sqrt(jnp.float32(q.shape[-1]))
    attn = jax.nn.softmax(s, axis=-1)                              # (B,1,N)
    rep = jnp.einsum("bqn,bnh->bqh", attn, v) @ params["wo"] + params["bo"]
    logits = (rep @ params["wc"] + params["bc"]).reshape(features.shape[0], -1)
    return logits, attn.reshape(features.shape[0], -1), proj


def init_params(key, input_dim, hidden_dim, n_classes):
    ks = jax.random.split(key, 13)
    g = lambda k, shape: (jax.random.normal(k, shape, jnp.float32) * 0.05)
    return {
        "wp": g(ks[0], (input_dim, hidden_dim)),
        "bp": g(ks[1], (1, hidden_dim)),
        "class_token": g(ks[2], (1, hidden_dim)),
        "wq": g(ks[3], (hidden_dim, hidden_dim)),
        "bq": g(ks[4], (1, hidden_dim)),
        "wk": g(ks[5], (hidden_dim, hidden_dim)),
        "bk": g(ks[6], (1, hidden_dim)),
        "wv": g(ks[7], (hidden_dim, hidden_dim)),
        "bv": g(ks[8], (1, hidden_dim)),
        "wo": g(ks[9], (hidden_dim, hidden_dim)),
        "bo": g(ks[10], (1, hidden_dim)),
        "wc": g(ks[11], (hidden_dim, n_classes)),
        "bc": g(ks[12], (1, n_classes)),
    }


if __name__ == "__main__":
    # N=200 with block_n=128 -> 2 instance chunks per bag: exercises the N-tiling,
    # padding/masking, streamed online softmax, and the finalize rescale loop.
    B, N, INPUT_DIM, HIDDEN_DIM, N_CLASSES = 2, 200, 128, 128, 4

    key = jax.random.PRNGKey(0)
    k_feat, k_param = jax.random.split(key)
    features = jax.random.normal(k_feat, (B, N, INPUT_DIM), jnp.float32)
    params = init_params(k_param, INPUT_DIM, HIDDEN_DIM, N_CLASSES)

    ref_logits, ref_attn, ref_proj = reference_forward(features, params)

    # Exact f32 path (tight tolerance against the unfused reference).
    logits, attn_scores, proj_feats = abmil_sb_forward(
        features, params, block_n=128, compute_dtype=jnp.float32)
    jax.block_until_ready((logits, attn_scores, proj_feats))
    assert jnp.allclose(logits, ref_logits, atol=1e-5, rtol=1e-5), "logits mismatch"
    assert jnp.allclose(attn_scores, ref_attn, atol=1e-5, rtol=1e-5), "attn mismatch"
    assert jnp.allclose(proj_feats, ref_proj, atol=1e-5, rtol=1e-5), "proj mismatch"

    # Default bf16 MXU path + bf16 proj writeback: validate ALL outputs (loose tol).
    logits_bf, attn_bf, proj_bf = abmil_sb_forward(
        features, params, block_n=128,
        compute_dtype=jnp.bfloat16, proj_dtype=jnp.bfloat16)
    jax.block_until_ready((logits_bf, attn_bf, proj_bf))
    assert jnp.allclose(logits_bf, ref_logits, atol=2e-2, rtol=5e-2), "bf16 logits mismatch"
    assert jnp.allclose(attn_bf, ref_attn, atol=2e-3, rtol=5e-2), "bf16 attn mismatch"
    assert jnp.allclose(proj_bf.astype(jnp.float32), ref_proj,
                        atol=5e-2, rtol=5e-2), "bf16 proj mismatch"

    # Default config (block_n=1024 -> single-chunk, no padding) sanity check.
    logits_d, attn_d, proj_d = abmil_sb_forward(features, params)
    jax.block_until_ready((logits_d, attn_d, proj_d))
    assert jnp.allclose(logits_d, ref_logits, atol=2e-2, rtol=5e-2), "default logits mismatch"

    print("KERNEL_OK")
</pallas_src>

<mosaic_0001>
module attributes {stable_mosaic.version = 11 : i64} {
  func.func @_abmil_sb_kernel(%arg0: i32, %arg1: i32, %arg2: memref<1x128x128xf32, #tpu.memory_space<vmem>>, %arg3: memref<128x128xf32, #tpu.memory_space<vmem>>, %arg4: memref<1x128xf32, #tpu.memory_space<vmem>>, %arg5: memref<1x128xf32, #tpu.memory_space<vmem>>, %arg6: memref<1x128x128xf32, #tpu.memory_space<vmem>>, %arg7: memref<1x1x256xf32, #tpu.memory_space<vmem>>, %arg8: memref<1x1x128xf32, #tpu.memory_space<vmem>>, %arg9: memref<1x1xf32, #tpu.memory_space<vmem>>, %arg10: memref<1x1xf32, #tpu.memory_space<vmem>>, %arg11: memref<1x128xf32, #tpu.memory_space<vmem>>, %arg12: memref<2x1xf32, #tpu.memory_space<vmem>>) attributes {dimension_semantics = [#tpu.dimension_semantics<parallel>, #tpu.dimension_semantics<arbitrary>], iteration_bounds = array<i64: 2, 2>, scalar_prefetch = 0 : i64, scratch_operands = 4 : i64, tpu.core_type = #tpu.core_type<tc>, window_params = [{transform_indices = @transform_0, window_bounds = array<i64: 1, 128, 128>}, {pipeline_mode = #tpu.pipeline_mode<synchronous>, transform_indices = @transform_1, window_bounds = array<i64: 128, 128>}, {pipeline_mode = #tpu.pipeline_mode<synchronous>, transform_indices = @transform_2, window_bounds = array<i64: 1, 128>}, {pipeline_mode = #tpu.pipeline_mode<synchronous>, transform_indices = @transform_3, window_bounds = array<i64: 1, 128>}, {transform_indices = @transform_4, window_bounds = array<i64: 1, 128, 128>}, {transform_indices = @transform_5, window_bounds = array<i64: 1, 1, 256>}, {transform_indices = @transform_6, window_bounds = array<i64: 1, 1, 128>}]} {
    %c0_i32 = arith.constant 0 : i32
    %0 = arith.cmpi eq, %arg1, %c0_i32 : i32
    %1 = arith.extui %0 : i1 to i32
    %c0_i32_0 = arith.constant 0 : i32
    %2 = arith.cmpi ne, %1, %c0_i32_0 : i32
    scf.if %2 {
      %cst_35 = arith.constant 0xFF800000 : f32
      %58 = vector.broadcast %cst_35 : f32 to vector<1x1xf32>
      %c0_36 = arith.constant 0 : index
      %c0_37 = arith.constant 0 : index
      %59 = vector.load %arg9[%c0_36, %c0_37] : memref<1x1xf32, #tpu.memory_space<vmem>>, vector<1x1xf32>
      tpu.vector_store %arg9[%c0_36, %c0_37], %58 {strides = array<i32>} : memref<1x1xf32, #tpu.memory_space<vmem>>, vector<1x1xf32>,
      %cst_38 = arith.constant 0.000000e+00 : f32
      %60 = vector.broadcast %cst_38 : f32 to vector<1x1xf32>
      %c0_39 = arith.constant 0 : index
      %c0_40 = arith.constant 0 : index
      %61 = vector.load %arg10[%c0_39, %c0_40] : memref<1x1xf32, #tpu.memory_space<vmem>>, vector<1x1xf32>
      tpu.vector_store %arg10[%c0_39, %c0_40], %60 {strides = array<i32>} : memref<1x1xf32, #tpu.memory_space<vmem>>, vector<1x1xf32>,
      %cst_41 = arith.constant 0.000000e+00 : f32
      %62 = vector.broadcast %cst_41 : f32 to vector<1x128xf32>
      %c0_42 = arith.constant 0 : index
      %c0_43 = arith.constant 0 : index
      %63 = vector.load %arg11[%c0_42, %c0_43] : memref<1x128xf32, #tpu.memory_space<vmem>>, vector<1x128xf32>
      tpu.vector_store %arg11[%c0_42, %c0_43], %62 {strides = array<i32>} : memref<1x128xf32, #tpu.memory_space<vmem>>, vector<1x128xf32>,
    } else {
    }
    %c0 = arith.constant 0 : index
    %c0_1 = arith.constant 0 : index
    %c0_2 = arith.constant 0 : index
    %3 = vector.load %arg2[%c0, %c0_1, %c0_2] : memref<1x128x128xf32, #tpu.memory_space<vmem>>, vector<1x128x128xf32>
    %4 = vector.shape_cast %3 : vector<1x128x128xf32> to vector<128x128xf32>
    %c0_3 = arith.constant 0 : index
    %c0_4 = arith.constant 0 : index
    %5 = vector.load %arg3[%c0_3, %c0_4] : memref<128x128xf32, #tpu.memory_space<vmem>>, vector<128x128xf32>
    %cst = arith.constant dense<0.000000e+00> : vector<128x128xf32>
    %6 = tpu.matmul %4, %5, %cst {dimension_numbers = #tpu.dot_dimension_numbers<[1], [0], [0], [1], [0, 0, 1, 1], [], []>} : vector<128x128xf32>, vector<128x128xf32>, vector<128x128xf32> -> vector<128x128xf32>
    %c0_5 = arith.constant 0 : index
    %c0_6 = arith.constant 0 : index
    %7 = vector.load %arg4[%c0_5, %c0_6] : memref<1x128xf32, #tpu.memory_space<vmem>>, vector<1x128xf32>
    %8 = vector.broadcast %7 : vector<1x128xf32> to vector<128x128xf32>
    %9 = arith.addf %6, %8 : vector<128x128xf32>
    %cst_7 = arith.constant 0.000000e+00 : f32
    %10 = vector.broadcast %cst_7 : f32 to vector<128x128xf32>
    %11 = arith.maximumf %9, %10 : vector<128x128xf32>
    %c0_8 = arith.constant 0 : index
    %c0_9 = arith.constant 0 : index
    %c0_10 = arith.constant 0 : index
    %12 = vector.load %arg6[%c0_8, %c0_9, %c0_10] : memref<1x128x128xf32, #tpu.memory_space<vmem>>, vector<1x128x128xf32>
    %13 = vector.shape_cast %12 : vector<1x128x128xf32> to vector<128x128xf32>
    %14 = vector.shape_cast %11 : vector<128x128xf32> to vector<1x128x128xf32>
    tpu.vector_store %arg6[%c0_8, %c0_9, %c0_10], %14 {strides = array<i32>} : memref<1x128x128xf32, #tpu.memory_space<vmem>>, vector<1x128x128xf32>,
    %c0_11 = arith.constant 0 : index
    %c0_12 = arith.constant 0 : index
    %15 = vector.load %arg5[%c0_11, %c0_12] : memref<1x128xf32, #tpu.memory_space<vmem>>, vector<1x128xf32>
    %cst_13 = arith.constant dense<0.000000e+00> : vector<1x128xf32>
    %16 = tpu.matmul %15, %11, %cst_13 {dimension_numbers = #tpu.dot_dimension_numbers<[1], [1], [0], [0], [0, 0, 1, 0], [], []>} : vector<1x128xf32>, vector<128x128xf32>, vector<1x128xf32> -> vector<1x128xf32>
    %c128_i32 = arith.constant 128 : i32
    %17 = arith.muli %arg1, %c128_i32 : i32
    %18 = tpu.iota {dimensions = array<i32: 1>} : vector<1x128xi32>
    %19 = vector.broadcast %17 : i32 to vector<1x128xi32>
    %20 = arith.addi %19, %18 : vector<1x128xi32>
    %c200_i32 = arith.constant 200 : i32
    %21 = vector.broadcast %c200_i32 : i32 to vector<1x128xi32>
    %22 = arith.cmpi slt, %20, %21 : vector<1x128xi32>
    %cst_14 = arith.constant -1.000000e+30 : f32
    %23 = vector.broadcast %cst_14 : f32 to vector<1x128xf32>
    %24 = arith.select %22, %16, %23 : vector<1x128xi1>, vector<1x128xf32>
    %c0_15 = arith.constant 0 : index
    %c0_16 = arith.constant 0 : index
    %25 = vector.load %arg9[%c0_15, %c0_16] : memref<1x1xf32, #tpu.memory_space<vmem>>, vector<1x1xf32>
    %cst_17 = arith.constant dense<0xFF800000> : vector<1xf32>
    %26 = vector.multi_reduction <maximumf>, %24, %cst_17 [1] : vector<1x128xf32> to vector<1xf32>
    %27 = vector.shape_cast %26 : vector<1xf32> to vector<1x1xf32>
    %28 = arith.maximumf %25, %27 : vector<1x1xf32>
    %29 = arith.subf %25, %28 : vector<1x1xf32>
    %30 = math.exp %29 : vector<1x1xf32>
    %31 = vector.broadcast %28 : vector<1x1xf32> to vector<1x128xf32>
    %32 = arith.subf %24, %31 : vector<1x128xf32>
    %33 = math.exp %32 : vector<1x128xf32>
    %c0_18 = arith.constant 0 : index
    %c0_19 = arith.constant 0 : index
    %34 = vector.load %arg10[%c0_18, %c0_19] : memref<1x1xf32, #tpu.memory_space<vmem>>, vector<1x1xf32>
    %35 = arith.mulf %30, %34 : vector<1x1xf32>
    %cst_20 = arith.constant dense<0.000000e+00> : vector<1xf32>
    %36 = vector.multi_reduction <add>, %33, %cst_20 [1] : vector<1x128xf32> to vector<1xf32>
    %37 = vector.shape_cast %36 : vector<1xf32> to vector<1x1xf32>
    %38 = arith.addf %35, %37 : vector<1x1xf32>
    %c0_21 = arith.constant 0 : index
    %c0_22 = arith.constant 0 : index
    %39 = vector.load %arg10[%c0_21, %c0_22] : memref<1x1xf32, #tpu.memory_space<vmem>>, vector<1x1xf32>
    tpu.vector_store %arg10[%c0_21, %c0_22], %38 {strides = array<i32>} : memref<1x1xf32, #tpu.memory_space<vmem>>, vector<1x1xf32>,
    %c0_23 = arith.constant 0 : index
    %c0_24 = arith.constant 0 : index
    %40 = vector.load %arg11[%c0_23, %c0_24] : memref<1x128xf32, #tpu.memory_space<vmem>>, vector<1x128xf32>
    %41 = vector.broadcast %30 : vector<1x1xf32> to vector<1x128xf32>
    %42 = arith.mulf %41, %40 : vector<1x128xf32>
    %cst_25 = arith.constant dense<0.000000e+00> : vector<1x128xf32>
    %43 = tpu.matmul %33, %11, %cst_25 {dimension_numbers = #tpu.dot_dimension_numbers<[1], [0], [0], [1], [0, 0, 1, 1], [], []>} : vector<1x128xf32>, vector<128x128xf32>, vector<1x128xf32> -> vector<1x128xf32>
    %44 = arith.addf %42, %43 : vector<1x128xf32>
    %c0_26 = arith.constant 0 : index
    %c0_27 = arith.constant 0 : index
    %45 = vector.load %arg11[%c0_26, %c0_27] : memref<1x128xf32, #tpu.memory_space<vmem>>, vector<1x128xf32>
    tpu.vector_store %arg11[%c0_26, %c0_27], %44 {strides = array<i32>} : memref<1x128xf32, #tpu.memory_space<vmem>>, vector<1x128xf32>,
    %c0_28 = arith.constant 0 : index
    %c0_29 = arith.constant 0 : index
    %46 = vector.load %arg9[%c0_28, %c0_29] : memref<1x1xf32, #tpu.memory_space<vmem>>, vector<1x1xf32>
    tpu.vector_store %arg9[%c0_28, %c0_29], %28 {strides = array<i32>} : memref<1x1xf32, #tpu.memory_space<vmem>>, vector<1x1xf32>,
    %47 = arith.index_cast %arg1 : i32 to index
    %c0_30 = arith.constant 0 : index
    %48 = vector.load %arg12[%47, %c0_30] : memref<2x1xf32, #tpu.memory_space<vmem>>, vector<1x1xf32>
    tpu.vector_store %arg12[%47, %c0_30], %28 {strides = array<i32>} : memref<2x1xf32, #tpu.memory_space<vmem>>, vector<1x1xf32>,
    %c128_i32_31 = arith.constant 128 : i32
    %49 = arith.muli %arg1, %c128_i32_31 : i32
    %50 = tpu.assume_multiple %49, 128 : i32
    %c0_32 = arith.constant 0 : index
    %c0_33 = arith.constant 0 : index
    %51 = arith.index_cast %50 : i32 to index
    %52 = vector.load %arg7[%c0_32, %c0_33, %51] : memref<1x1x256xf32, #tpu.memory_space<vmem>>, vector<1x1x128xf32>
    %53 = vector.shape_cast %52 : vector<1x1x128xf32> to vector<1x128xf32>
    %54 = vector.shape_cast %33 : vector<1x128xf32> to vector<1x1x128xf32>
    tpu.vector_store %arg7[%c0_32, %c0_33, %51], %54 {strides = array<i32>} : memref<1x1x256xf32, #tpu.memory_space<vmem>>, vector<1x1x128xf32>,
    %c1_i32 = arith.constant 1 : i32
    %55 = arith.cmpi eq, %arg1, %c1_i32 : i32
    %56 = arith.extui %55 : i1 to i32
    %c0_i32_34 = arith.constant 0 : i32
    %57 = arith.cmpi ne, %56, %c0_i32_34 : i32
    scf.if %57 {
      %c0_35 = arith.constant 0 : index
      %c0_36 = arith.constant 0 : index
      %58 = vector.load %arg10[%c0_35, %c0_36] : memref<1x1xf32, #tpu.memory_space<vmem>>, vector<1x1xf32>
      %59 = tpu.reciprocal %58 : vector<1x1xf32> -> vector<1x1xf32>
      %c0_37 = arith.constant 0 : index
      %c0_38 = arith.constant 0 : index
      %60 = vector.load %arg9[%c0_37, %c0_38] : memref<1x1xf32, #tpu.memory_space<vmem>>, vector<1x1xf32>
      %c0_i32_39 = arith.constant 0 : i32
      %61 = arith.index_cast %c0_i32_39 : i32 to index
      %c0_40 = arith.constant 0 : index
      %62 = vector.load %arg12[%61, %c0_40] : memref<2x1xf32, #tpu.memory_space<vmem>>, vector<1x1xf32>
      %63 = arith.subf %62, %60 : vector<1x1xf32>
      %64 = math.exp %63 : vector<1x1xf32>
      %65 = arith.mulf %64, %59 : vector<1x1xf32>
      %c128_i32_41 = arith.constant 128 : i32
      %66 = arith.muli %c0_i32_39, %c128_i32_41 : i32
      %67 = tpu.assume_multiple %66, 128 : i32
      %c0_42 = arith.constant 0 : index
      %c0_43 = arith.constant 0 : index
      %68 = arith.index_cast %67 : i32 to index
      %69 = vector.load %arg7[%c0_42, %c0_43, %68] : memref<1x1x256xf32, #tpu.memory_space<vmem>>, vector<1x1x128xf32>
      %70 = vector.shape_cast %69 : vector<1x1x128xf32> to vector<1x128xf32>
      %71 = vector.broadcast %65 : vector<1x1xf32> to vector<1x128xf32>
      %72 = arith.mulf %70, %71 : vector<1x128xf32>
      %c0_44 = arith.constant 0 : index
      %c0_45 = arith.constant 0 : index
      %73 = arith.index_cast %67 : i32 to index
      %74 = vector.load %arg7[%c0_44, %c0_45, %73] : memref<1x1x256xf32, #tpu.memory_space<vmem>>, vector<1x1x128xf32>
      %75 = vector.shape_cast %74 : vector<1x1x128xf32> to vector<1x128xf32>
      %76 = vector.shape_cast %72 : vector<1x128xf32> to vector<1x1x128xf32>
      tpu.vector_store %arg7[%c0_44, %c0_45, %73], %76 {strides = array<i32>} : memref<1x1x256xf32, #tpu.memory_space<vmem>>, vector<1x1x128xf32>,
      %c1_i32_46 = arith.constant 1 : i32
      %77 = arith.index_cast %c1_i32_46 : i32 to index
      %c0_47 = arith.constant 0 : index
      %78 = vector.load %arg12[%77, %c0_47] : memref<2x1xf32, #tpu.memory_space<vmem>>, vector<1x1xf32>
      %79 = arith.subf %78, %60 : vector<1x1xf32>
      %80 = math.exp %79 : vector<1x1xf32>
      %81 = arith.mulf %80, %59 : vector<1x1xf32>
      %c128_i32_48 = arith.constant 128 : i32
      %82 = arith.muli %c1_i32_46, %c128_i32_48 : i32
      %83 = tpu.assume_multiple %82, 128 : i32
      %c0_49 = arith.constant 0 : index
      %c0_50 = arith.constant 0 : index
      %84 = arith.index_cast %83 : i32 to index
      %85 = vector.load %arg7[%c0_49, %c0_50, %84] : memref<1x1x256xf32, #tpu.memory_space<vmem>>, vector<1x1x128xf32>
      %86 = vector.shape_cast %85 : vector<1x1x128xf32> to vector<1x128xf32>
      %87 = vector.broadcast %81 : vector<1x1xf32> to vector<1x128xf32>
      %88 = arith.mulf %86, %87 : vector<1x128xf32>
      %c0_51 = arith.constant 0 : index
      %c0_52 = arith.constant 0 : index
      %89 = arith.index_cast %83 : i32 to index
      %90 = vector.load %arg7[%c0_51, %c0_52, %89] : memref<1x1x256xf32, #tpu.memory_space<vmem>>, vector<1x1x128xf32>
      %91 = vector.shape_cast %90 : vector<1x1x128xf32> to vector<1x128xf32>
      %92 = vector.shape_cast %88 : vector<1x128xf32> to vector<1x1x128xf32>
      tpu.vector_store %arg7[%c0_51, %c0_52, %89], %92 {strides = array<i32>} : memref<1x1x256xf32, #tpu.memory_space<vmem>>, vector<1x1x128xf32>,
      %c2_i32 = arith.constant 2 : i32
      %c0_53 = arith.constant 0 : index
      %c0_54 = arith.constant 0 : index
      %93 = vector.load %arg11[%c0_53, %c0_54] : memref<1x128xf32, #tpu.memory_space<vmem>>, vector<1x128xf32>
      %94 = vector.broadcast %59 : vector<1x1xf32> to vector<1x128xf32>
      %95 = arith.mulf %93, %94 : vector<1x128xf32>
      %c0_55 = arith.constant 0 : index
      %c0_56 = arith.constant 0 : index
      %c0_57 = arith.constant 0 : index
      %96 = vector.load %arg8[%c0_55, %c0_56, %c0_57] : memref<1x1x128xf32, #tpu.memory_space<vmem>>, vector<1x1x128xf32>
      %97 = vector.shape_cast %96 : vector<1x1x128xf32> to vector<1x128xf32>
      %98 = vector.shape_cast %95 : vector<1x128xf32> to vector<1x1x128xf32>
      tpu.vector_store %arg8[%c0_55, %c0_56, %c0_57], %98 {strides = array<i32>} : memref<1x1x128xf32, #tpu.memory_space<vmem>>, vector<1x1x128xf32>,
    } else {
    }
    return
  }
  func.func @transform_0(%arg0: i32, %arg1: i32) -> (i32, i32, i32) {
    %c0_i32 = arith.constant 0 : i32
    %c0_i32_0 = arith.constant 0 : i32
    return %arg0, %arg1, %c0_i32 : i32, i32, i32
  }
  func.func @transform_1(%arg0: i32, %arg1: i32) -> (i32, i32) {
    %c0_i32 = arith.constant 0 : i32
    %c0_i32_0 = arith.constant 0 : i32
    %c0_i32_1 = arith.constant 0 : i32
    return %c0_i32, %c0_i32_0 : i32, i32
  }
  func.func @transform_2(%arg0: i32, %arg1: i32) -> (i32, i32) {
    %c0_i32 = arith.constant 0 : i32
    %c0_i32_0 = arith.constant 0 : i32
    %c0_i32_1 = arith.constant 0 : i32
    return %c0_i32, %c0_i32_0 : i32, i32
  }
  func.func @transform_3(%arg0: i32, %arg1: i32) -> (i32, i32) {
    %c0_i32 = arith.constant 0 : i32
    %c0_i32_0 = arith.constant 0 : i32
    %c0_i32_1 = arith.constant 0 : i32
    return %c0_i32, %c0_i32_0 : i32, i32
  }
  func.func @transform_4(%arg0: i32, %arg1: i32) -> (i32, i32, i32) {
    %c0_i32 = arith.constant 0 : i32
    %c0_i32_0 = arith.constant 0 : i32
    return %arg0, %arg1, %c0_i32 : i32, i32, i32
  }
  func.func @transform_5(%arg0: i32, %arg1: i32) -> (i32, i32, i32) {
    %c0_i32 = arith.constant 0 : i32
    %c0_i32_0 = arith.constant 0 : i32
    %c0_i32_1 = arith.constant 0 : i32
    return %arg0, %c0_i32, %c0_i32_0 : i32, i32, i32
  }
  func.func @transform_6(%arg0: i32, %arg1: i32) -> (i32, i32, i32) {
    %c0_i32 = arith.constant 0 : i32
    %c0_i32_0 = arith.constant 0 : i32
    %c0_i32_1 = arith.constant 0 : i32
    return %arg0, %c0_i32, %c0_i32_0 : i32, i32, i32
  }
}

</mosaic_0001>

<bundles_post_ra>
// kernel: tpu_custom_call.1
= control target key start
LH: loop header
LB: loop body
LE: loop exit
PB: predicated region body
PF: predicated region fallthrough
CT: control target
= control target key end

     0   :  { %s2109_s0 = inlined_call_operand.hbm [shape: f32[2,256,128], index: 0, kind: input, shape index: {}]   ;;  %s2110_s1 = inlined_call_operand.hbm [shape: f32[128,128], index: 1, kind: input, shape index: {}]   ;;  %s2111_s2 = inlined_call_operand.vmem [shape: f32[1,128], index: 2, kind: input, shape index: {}]   ;;  %s2112_s3 = inlined_call_operand.vmem [shape: f32[1,128], index: 3, kind: input, shape index: {}]   ;;  %s2113_s4 = inlined_call_operand.hbm [shape: f32[2,256,128], index: 4, kind: output, shape index: {0}]   ;;  %s2114_s5 = inlined_call_operand.hbm [shape: f32[2,1,256], index: 5, kind: output, shape index: {1}]   ;;  %s2115_s6 = inlined_call_operand.hbm [shape: f32[2,1,128], index: 6, kind: output, shape index: {2}]  }
   0x1   :  { %2136 = sst [smem:[#allocation29_spill]] %s2109_s0 }
   0x2   :  { %2137 = sst [smem:[#allocation30_spill]] %s2110_s1 }
   0x3   :  { %2138 = sst [smem:[#allocation31_spill]] %s2111_s2 }
   0x4   :  { %2139 = sst [smem:[#allocation32_spill]] %s2112_s3 }
   0x5   :  { %2140 = sst [smem:[#allocation33_spill]] %s2113_s4 }
   0x6   :  { %2141 = sst [smem:[#allocation34_spill]] %s2114_s5 }
   0x7   :  { %2142 = sst [smem:[#allocation35_spill]] %s2115_s6 }
   0x8   :  { %12 = vsyncpa [#allocation7], 0 }
   0x9   :  { %14 = vsyncpa [#allocation7 + $0x1], 0 }
   0xa   :  { %15 = vsyncpa [#allocation10], 0 }
   0xb   :  { %16 = vsyncpa [#allocation8], 0 }
   0xc   :  { %18 = vsyncpa [#allocation8 + $0x1], 0 }
   0xd   :  { %19 = vsyncpa [#allocation13], 0 }
   0xe   :  { %21 = vsyncpa [#allocation13 + $0x1], 0  ;;  %s1660_s21 = smov 0   ;;  %s1662_s22 = smov 0  }
   0xf   :  { %s1664_s23 = smov 0   ;;  %s1666_s24 = smov 0  }
  0x10   :  { %s1668_s25 = smov 0   ;;  %s1670_s26 = smov 0  }
  0x11   :  { %s1672_s27 = smov 0   ;;  %s1674_s28 = smov 0  }
  0x12   :  { %s1676_s29 = smov 0   ;;  %s1678_s30 = smov 0  }
  0x13   :  { %s1680_s7 = smov 0  }
  0x14 LB: > { %2143 = sst [smem:[#allocation19_spill]] %s1580_s24  ;;  %s1714_s8 = sadd.s32 4294967295, %s1608_s7   ;;  %s1608_s7 = sphi %s1680_s7, %s27_s7   ;;  %s1604_s30 = sphi %s1678_s30, %s2187_s30   ;;  %s1600_s29 = sphi %s1676_s29, %s2186_s29   ;;  %s1596_s28 = sphi %s1674_s28, %s2185_s28   ;;  %s1592_s27 = sphi %s1672_s27, %s2184_s27   ;;  %s1588_s26 = sphi %s1670_s26, %s2193_s26   ;;  %s1584_s25 = sphi %s1668_s25, %s2192_s25   ;;  %s1580_s24 = sphi %s1666_s24, %s2191_s24   ;;  %s1576_s23 = sphi %s1664_s23, %s2190_s23   ;;  %s1572_s22 = sphi %s1662_s22, %s2189_s22   ;;  %s1568_s21 = sphi %s1660_s21, %s2188_s21  }
  0x15   : > { %2144 = sst [smem:[#allocation20_spill]] %s1596_s28  ;;  %s2118_s9 = sadd.s32 4294967294, %s1608_s7  }
  0x16   : > { %2145 = sst [smem:[#allocation21_spill]] %s1600_s29  ;;  %p61_p0 = scmp.ne.s32.totalorder %s1584_s25, %s1580_s24 }
  0x17   : > { %2146 = sst [smem:[#allocation22_spill]] %s1604_s30  ;;  %p62_p1 = scmp.eq.s32.totalorder %s1714_s8, 0 }
  0x18   : > { %p2116_p2 = scmp.eq.s32.totalorder %s1714_s8, 3  ;;  %p156_p3 = scmp.eq.s32.totalorder %s2118_s9, 3 }
  0x19   : > { %p1725_p4 = por %p62_p1, %p61_p0  ;;  %p175_p6 = scmp.ne.s32.totalorder %s1576_s23, %s1572_s22 }
  0x1a   : > { %p1730_p5 = por %p156_p3, %p61_p0  ;;  %p181_p7 = scmp.ne.s32.totalorder %s1572_s22, %s1568_s21 }
  0x1b   : > { %p1006_p8 = scmp.ge.s32.totalorder %s1608_s7, 1  ;;  %p1740_p9 = por %p175_p6, %p2116_p2 }
  0x1c   : > { %s2148_s12 = scalar_select %p1730_p5, 1, 0 }
  0x1d   : > { %s2150_s13 = scalar_select %p1740_p9, 1, 0 }
  0x1e   : > { %2149 = sst [smem:[#allocation23_spill]] %s2148_s12  ;;  %p215_p10 = scmp.lt.s32.totalorder %s1608_s7, 5 }
  0x1f   : > { %2151 = sst [smem:[#allocation24_spill]] %s2150_s13  ;;  %p1745_p11 = por %p181_p7, %p156_p3 }
  0x20   : > { %p1749_p12 = pnand %p1006_p8, %p215_p10  ;;  %s1610_s16 = smov [#allocation9]  }
  0x21   : > { %s2152_s14 = scalar_select %p1745_p11, 1, 0 }
  0x22   : > { %s227_s17 = sshll.u32 %s1610_s16, 4  ;;  %p1239_p13 = pneg %p1749_p12  ;;  %s228_s17 = int_to_ptr.vmem [resolvable:$true] %s227_s17 }
  0x23   : > { %2153 = sst [smem:[#allocation25_spill]] %s2152_s14  ;;  %s1385_s18 = scalar_lea.vmem %s228_s17, 2048 }
  0x24   : > { %p1240_p0 = pnand %p1239_p13, %p62_p1  ;;  %p1386_p2 = scmp.ne.s32.totalorder %s228_s17, %s1385_s18 }
  0x25   : > { %p1393_p7 = scmp.lt.s32.totalorder %s228_s17, %s228_s17  ;;  %p1394_p9 = scmp.lt.s32.totalorder %s1385_s18, %s1385_s18 }
  0x26   : > { %p1376_p6 = pneg %p1240_p0 }
  0x27   : > { %p1395_p11 = por %p1394_p9, %p1393_p7 }
  0x28   : > { %p1388_p5 = pnand %p1386_p2, %p1376_p6 }
  0x2a   : > { %p1389_p3 = pneg %p1388_p5 }
  0x2c   : > { %p1396_p8 = pnand %p1395_p11, %p1389_p3 }
  0x2e   : > { %1399 = shalt.err (!%p1396_p8)
}
  0x2f   : > { %s2120_s19 = smov 128   ;;  %s2121_s20 = smov 8  }
  0x30   : > { %s2155_s1 = sld [smem:[#allocation30_spill]]  ;;  %s36_s18 = sadd.s32 1, %s1600_s29 }
  0x31   : > { %s39_s9 = sadd.s32 1, %s1604_s30  ;;  %p37_p2 = scmp.ge.s32.totalorder %s36_s18, 2 }
  0x32   : > { %s48_s11 = sadd.s32 1, %s1588_s26  ;;  %p55_p5 = scmp.ne.s32.totalorder %s1588_s26, %s1584_s25 }
  0x33   : > { %p56_p9 = scmp.eq.s32.totalorder %s1608_s7, 0  ;;  %s2195_s18 = smov (%p37_p2, %s36_s18), 0 }
  0x34   : > { %2156 = sst [smem:[#allocation26_spill]] %s2195_s18  ;;  %s2197_s9 = smov (!%p37_p2, %s39_s9), %s1604_s30 }
  0x35   : > { %s44_s14 = ssub.s32 %s1600_s29, %s2195_s18  ;;  %p1774_p10 = por %p56_p9, %p55_p5 }
  0x36   : > { %1242 = dma.hbm_to_vmem [thread:$0]  (!%p1240_p0), %s2155_s1, 2048, %s228_s17, [#allocation10], %s2120_s19, %s2120_s19, %s2121_s20  }
  0x37   : > { %p41_p11 = scmp.ge.s32.totalorder %s2197_s9, 2  ;;  %p2158_p13 = scmp.eq.s32.totalorder %s1714_s8, 3 }
  0x38   : > { %p1258_p6 = scmp.lt.s32.totalorder %s1608_s7, 4  ;;  %s247_s16 = sand.u32 1, %s1588_s26  }
  0x39   : > { %p1780_p0 = por %p2158_p13, %p55_p5  ;;  %s2199_s9 = smov (%p41_p11, %s2197_s9), 0 }
  0x3a   : > { %2161 = sst [smem:[#allocation28_spill]] %s2199_s9  ;;  %s1009_s19 = sshll.u32 %s247_s16, 7 }
  0x3b   : > { %s2159_s17 = scalar_select %p1780_p0, 1, 0 }
  0x3c   : > { %s43_s20 = ssub.s32 %s1604_s30, %s2199_s9  ;;  %s1010_s18 = sshll.u32 %s1600_s29, 4 }
  0x3d   : > { %2160 = sst [smem:[#allocation27_spill]] %s2159_s17  ;;  %s45_s1 = sor.u32 %s44_s14, %s43_s20 }
  0x3e   : > { %p163_p3 = scmp.eq.s32.totalorder %s43_s20, 0  ;;  %p46_p7 = scmp.eq.s32.totalorder %s45_s1, 0 }
  0x3f   : > { %s2162_s12 = sadd.s32 1, %s1576_s23  ;;  %s1011_s4 = sshll.u32 %s1604_s30, 5 }
  0x40   : > { %s1794_s24 = scalar_select %p163_p3, %s1576_s23, %s2162_s12  }
  0x41   : > { %s1797_s6 = scalar_select %p46_p7, %s1588_s26, %s48_s11  }
  0x42   : > { %s251_s17 = scalar_lea.vmem [#allocation6], %s1009_s19  ;;  %s257_s13 = sadd.s32 %s1011_s4, %s1010_s18 }
  0x43   : > { %s260_s5 = sshll.u32 %s251_s17, 4  ;;  %s1012_s28 = sshll.u32 %s257_s13, 7  ;;  %s261_s5 = int_to_ptr.vmem [resolvable:$true] %s260_s5 }
  0x44   : > { %p1804_p8 = pnand %p1258_p6, %p1774_p10  ;;  %s2164_s0 = sld [smem:[#allocation29_spill]] }
  0x45   : > { %s248_s20 = scalar_lea.sflag [#allocation7], %s247_s16  ;;  %s1413_s11 = scalar_lea.vmem %s261_s5, 2048 }
  0x46   : > { %p1402_p2 = pneg %p1804_p8  ;;  %p1414_p5 = scmp.ne.s32.totalorder %s261_s5, %s1413_s11 }
  0x47   : > { %s1613_s4 = smov [#allocation6]  }
  0x48   : > { %p1416_p9 = pnand %p1414_p5, %p1402_p2  ;;  %s1418_s13 = sshll.u32 %s1613_s4, 4  ;;  %s1419_s13 = int_to_ptr.vmem [resolvable:$false] %s1418_s13 }
  0x49   : > { %s1420_s19 = scalar_lea.vmem %s1419_s13, 4096  ;;  %p1421_p10 = scmp.lt.s32.totalorder %s261_s5, %s1419_s13 }
  0x4a   : > { %s259_s12 = scalar_lea.hbm %s2164_s0, %s1012_s28  ;;  %p1417_p11 = pneg %p1416_p9 }
  0x4b   : > { %p1422_p13 = scmp.lt.s32.totalorder %s1420_s19, %s1413_s11 }
  0x4d   : > { %p1423_p6 = por %p1422_p13, %p1421_p10 }
  0x4f   : > { %p1424_p3 = pnand %p1423_p6, %p1417_p11 }
  0x51   : > { %1427 = shalt.err (!%p1424_p3)
}
  0x52   : > { %s2165_s18 = smov 8   ;;  %s2166_s28 = smov 128  }
  0x53   : > { %1246 = dma.hbm_to_vmem [thread:$0]  (!%p1804_p8), %s259_s12, 2048, %s261_s5, %s248_s20, %s2166_s28, %s2166_s28, %s2165_s18  }
  0x54   : > { %272 = sbr.rel (%p1749_p12) target bundleno = 1326 (0x52e), region = 36  ;;  %s1821_s21 = sand.u32 (!%p1749_p12), 1, %s1584_s25  }
  0x55   : > { %s1014_s17 = sshll.u32 (!%p1749_p12), %s1821_s21, 7  ;;  %s275_s16 = scalar_lea.sflag (!%p1749_p12), [#allocation7], %s1821_s21 }
  0x56   : > { %s1825_s14 = scalar_lea.vmem (!%p1749_p12), [#allocation6], %s1014_s17 }
  0x59   : > { %1551 = dma.done.wait (%p1725_p4), %s275_s16, 2048  }
  0x5a   : > { %1553 = vsyncadd (%p1725_p4), %s275_s16, 4294965248 }
  0x5b   : > { %1555 = dma.done.wait (%p62_p1), [#allocation10], 2048  }
  0x5c   : > { %1557 = vsyncadd (%p62_p1), [#allocation10], 4294965248  ;;  %s311_s3 = sand.u32 1, %s1572_s22   ;;  %s1836_s15 = scalar_lea.vmem [#allocation11], %s1014_s17 }
  0x5d   : > { %s1017_s5 = sshll.u32 %s311_s3, 1  ;;  %s1840_s12 = scalar_lea.vmem [#allocation14], %s311_s3 }
  0x5e   : > { %s1838_s1 = scalar_lea.vmem [#allocation12], %s1017_s5  ;;  %p1018_p12 = scmp.ne.s32.totalorder %s1592_s27, 0 }
  0x60   : > { %325 = sbr.rel (%p1018_p12) target bundleno = 104 (0x68), region = 48 }
  0x65   : > { %vm326_vm0 = vcmask 0   ;;  %v1614_v0 = vmov -inf   ;;  %v1615_v1 = vmov 0.0  }
  0x66   : > { %327 = vst.msk [vmem:[#allocation2] sm:$0x1] %vm326_vm0, %v1614_v0  ;;  %328 = vst.msk [vmem:[#allocation3] sm:$0x1] %vm326_vm0, %v1615_v1 }
  0x67   : > { %329 = vst [vmem:[#allocation4] sm:$0x1] %v1615_v1 }
  0x68 PF: > { %v361_v2 = vld [vmem:[#allocation9 + $0x78] sm:$0xff]  ;;  %v360_v3 = vld [vmem:[#allocation9 + $0x70] sm:$0xff]  ;;  %v359_v4 = vld [vmem:[#allocation9 + $0x68] sm:$0xff]  ;;  %v1616_v34 = vmov 0.0   ;;  %vm1617_vm1 = vmmov 0   ;;  %s2167_s2 = sld [smem:[#allocation31_spill]] }
  0x69   : > { %1101 = vmatprep.subr.mxu0 %v361_v2  ;;  %v358_v5 = vld [vmem:[#allocation9 + $0x60] sm:$0xff]  ;;  %v357_v7 = vld [vmem:[#allocation9 + $0x58] sm:$0xff]  ;;  %v356_v8 = vld [vmem:[#allocation9 + $0x50] sm:$0xff]  ;;  %1157 = vmatprep.subr.mxu1 %v1616_v34  ;;  %s2168_s13 = sld [smem:[#allocation32_spill]]  ;;  %s1020_s19 = sshll.u32 %s1592_s27, 7  ;;  %vm625_vm3 = vcmask 1040384  }
  0x6a   : > { %1102 = vmatpush3.msra.mxu0 %v361_v2  ;;  %v330_v6 = vld [vmem:[%s1825_s14] sm:$0xff]  ;;  %v355_v9 = vld [vmem:[#allocation9 + $0x48] sm:$0xff]  ;;  %v353_v11 = vld [vmem:[#allocation9 + $0x38] sm:$0xff]  ;;  %1189 = vmatprep.mubr.msk.f32.mxu1 %vm1617_vm1, %v1616_v34  ;;  %vm651_vm4 = vcmask 0   ;;  %s737_s18 = scalar_lea.vmem [#allocation5], %s1592_s27  ;;  %s739_s28 = sshra.s32 %s1020_s19, 7 }
  0x6b   : > { %1103 = vmatprep.subr.mxu0 %v360_v3  ;;  %1133 = vmatprep.mubr.f32.mxu0 %v330_v6  ;;  %v354_v10 = vld [vmem:[#allocation9 + $0x40] sm:$0xff]  ;;  %v352_v12 = vld [vmem:[#allocation9 + $0x30] sm:$0xff]  ;;  %v351_v13 = vld [vmem:[#allocation9 + $0x28] sm:$0xff]  ;;  %s741_s17 = scalar_lea.vmem %s1838_s1, %s739_s28 [#allocation12]  ;;  %p1021_p1 = scmp.ne.s32.totalorder %s1592_s27, 1 }
  0x6c   : > { %1104 = vmatpush3.msra.mxu0 %v360_v3  ;;  %v350_v14 = vld [vmem:[#allocation9 + $0x20] sm:$0xff]  ;;  %v349_v15 = vld [vmem:[#allocation9 + $0x18] sm:$0xff]  ;;  %v348_v16 = vld [vmem:[#allocation9 + $0x10] sm:$0xff] }
  0x6d   : > { %1105 = vmatprep.subr.mxu0 %v359_v4  ;;  %v347_v17 = vld [vmem:[#allocation9 + $0x8] sm:$0xff]  ;;  %v346_v18 = vld [vmem:[#allocation9] sm:$0xff]  ;;  %v332_v20 = vld [vmem:[%s1825_s14 + $0x10] sm:$0xff] }
  0x6e   : > { %1106 = vmatpush3.msra.mxu0 %v359_v4  ;;  %v331_v19 = vld [vmem:[%s1825_s14 + $0x8] sm:$0xff]  ;;  %v333_v21 = vld [vmem:[%s1825_s14 + $0x18] sm:$0xff]  ;;  %v334_v22 = vld [vmem:[%s1825_s14 + $0x20] sm:$0xff] }
  0x6f   : > { %1107 = vmatprep.subr.mxu0 %v358_v5  ;;  %v335_v23 = vld [vmem:[%s1825_s14 + $0x28] sm:$0xff]  ;;  %v336_v24 = vld [vmem:[%s1825_s14 + $0x30] sm:$0xff]  ;;  %v337_v25 = vld [vmem:[%s1825_s14 + $0x38] sm:$0xff] }
  0x70   : > { %1108 = vmatpush3.msra.mxu0 %v358_v5  ;;  %v338_v26 = vld [vmem:[%s1825_s14 + $0x40] sm:$0xff]  ;;  %v339_v27 = vld [vmem:[%s1825_s14 + $0x48] sm:$0xff]  ;;  %v340_v28 = vld [vmem:[%s1825_s14 + $0x50] sm:$0xff] }
  0x71   : > { %1109 = vmatprep.subr.mxu0 %v357_v7  ;;  %v341_v29 = vld [vmem:[%s1825_s14 + $0x58] sm:$0xff]  ;;  %v342_v30 = vld [vmem:[%s1825_s14 + $0x60] sm:$0xff]  ;;  %v343_v31 = vld [vmem:[%s1825_s14 + $0x68] sm:$0xff] }
  0x72   : > { %1110 = vmatpush3.msra.mxu0 %v357_v7  ;;  %v344_v32 = vld [vmem:[%s1825_s14 + $0x70] sm:$0xff]  ;;  %v345_v33 = vld [vmem:[%s1825_s14 + $0x78] sm:$0xff] }
  0x73   : > { %1111 = vmatprep.subr.mxu0 %v356_v8  ;;  %v1019_v35 = vld [vmem:[%s2167_s2] ss:$0 sm:$0xff] }
  0x74   : > { %1112 = vmatpush3.msra.mxu0 %v356_v8 }
  0x75   : > { %1113 = vmatprep.subr.mxu0 %v355_v9 }
  0x76   : > { %1114 = vmatpush3.msra.mxu0 %v355_v9 }
  0x77   : > { %1115 = vmatprep.subr.mxu0 %v354_v10 }
  0x78   : > { %1116 = vmatpush3.msra.mxu0 %v354_v10 }
  0x79   : > { %1117 = vmatprep.subr.mxu0 %v353_v11 }
  0x7a   : > { %1118 = vmatpush3.msra.mxu0 %v353_v11 }
  0x7b   : > { %1119 = vmatprep.subr.mxu0 %v352_v12 }
  0x7c   : > { %1120 = vmatpush3.msra.mxu0 %v352_v12 }
  0x7d   : > { %1121 = vmatprep.subr.mxu0 %v351_v13 }
  0x7e   : > { %1122 = vmatpush3.msra.mxu0 %v351_v13 }
  0x7f   : > { %1123 = vmatprep.subr.mxu0 %v350_v14 }
  0x80   : > { %1124 = vmatpush3.msra.mxu0 %v350_v14 }
  0x81   : > { %1125 = vmatprep.subr.mxu0 %v349_v15 }
  0x82   : > { %1126 = vmatpush3.msra.mxu0 %v349_v15 }
  0x83   : > { %1127 = vmatprep.subr.mxu0 %v348_v16 }
  0x84   : > { %1128 = vmatpush3.msra.mxu0 %v348_v16 }
  0x85   : > { %1129 = vmatprep.subr.mxu0 %v347_v17 }
  0x86   : > { %1130 = vmatpush3.msra.mxu0 %v347_v17 }
  0x87   : > { %1131 = vmatprep.subr.mxu0 %v346_v18 }
  0x88   : > { %1132 = vmatpush3.msra.mxu0 %v346_v18 }
  0x89   : > { %1134 = vmatmul.mubr.f32.vlgmr.msra.gmra.mxu0 %v331_v19  ;;  %1192 = vmatprep.subr.mxu0 %v1616_v34 }
  0x8a   : > { %1136 = vmatprep.mubr.f32.mxu0 %v332_v20  ;;  %v546_v20 = vld [vmem:[%s2168_s13] sm:$0x1] }
  0x8d   : > { %1137 = vmatmul.mubr.f32.gmra.mxu0 %v333_v21  ;;  %v618_v21 = vlaneseq }
  0x8e   : > { %1139 = vmatprep.mubr.f32.mxu0 %v334_v22 }
  0x8f   : > { %v619_v22 = vand.u32 127, %v618_v21  ;;  %vm1971_vm5 = vcmp.lt.s32.totalorder %v618_v21, 128 }
  0x91   : > { %1140 = vmatmul.mubr.f32.gmra.mxu0 %v335_v23  ;;  %v620_v23 = vstv %s1020_s19 }
  0x92   : > { %1142 = vmatprep.mubr.f32.mxu0 %v336_v24  ;;  %v621_v24 = vadd.s32 %v620_v23, %v619_v22 }
  0x94   : > { %vm622_vm2 = vcmp.lt.s32.totalorder %v621_v24, 200 }
  0x95   : > { %1143 = vmatmul.mubr.f32.gmra.mxu0 %v337_v25 }
  0x96   : > { %1145 = vmatprep.mubr.f32.mxu0 %v338_v26 }
  0x99   : > { %1146 = vmatmul.mubr.f32.gmra.mxu0 %v339_v27 }
  0x9a   : > { %1148 = vmatprep.mubr.f32.mxu0 %v340_v28 }
  0x9d   : > { %1149 = vmatmul.mubr.f32.gmra.mxu0 %v341_v29  ;;  %v1618_v29 = vmov 0  }
  0x9e   : > { %1151 = vmatprep.mubr.f32.mxu0 %v342_v30  ;;  %1360 = vset.pattern.permute.xlu0 %v1618_v29  ;;  %v624_v30 = vld [vmem:[#allocation2] sm:$0x1] }
  0x9f   : > { %1361 = vset.pattern.permute.xlu1 %v1618_v29 }
  0xa1   : > { %1152 = vmatmul.mubr.f32.gmra.mxu0 %v343_v31 }
  0xa2   : > { %1154 = vmatprep.mubr.f32.mxu0 %v344_v32 }
  0xa5   : > { %1155 = vmatmul.mubr.f32.gmra.mxu0 %v345_v33 }
  0xa6   : > { %1224 = vmatprep.mubr.msk.f32.mxu0 %vm1617_vm1, %v1616_v34 }
 0x149   : > { %v1135_v36 = vpop.f32.mrf.mxu0 }
 0x14a   : > { %v441_v37 = vadd.f32 %v1135_v36, %v1019_v35 }
 0x14b   : > { %v435_v38 = vpop.f32.mrf.mxu0 }
 0x14c   : > { %v1866_v39 = vmax.f32 %v441_v37, 0.0  ;;  %v436_v40 = vadd.f32 %v1019_v35, %v435_v38 }
 0x14d   : > { %v1138_v41 = vpop.f32.mrf.mxu0 }
 0x14e   : > { %531 = vst [vmem:[%s1836_s15 + $0x8] sm:$0xff] %v1866_v39  ;;  %v1870_v42 = vmax.f32 %v436_v40, 0.0  ;;  %v451_v43 = vadd.f32 %v1138_v41, %v1019_v35 }
 0x14f   : > { %v445_v44 = vpop.f32.mrf.mxu0 }
 0x150   : > { %530 = vst [vmem:[%s1836_s15] sm:$0xff] %v1870_v42  ;;  %v1874_v45 = vmax.f32 %v451_v43, 0.0  ;;  %v446_v46 = vadd.f32 %v1019_v35, %v445_v44 }
 0x151   : > { %v1141_v47 = vpop.f32.mrf.mxu0 }
 0x152   : > { %533 = vst [vmem:[%s1836_s15 + $0x18] sm:$0xff] %v1874_v45  ;;  %v1878_v48 = vmax.f32 %v446_v46, 0.0  ;;  %v461_v49 = vadd.f32 %v1141_v47, %v1019_v35 }
 0x153   : > { %v455_v50 = vpop.f32.mrf.mxu0 }
 0x154   : > { %532 = vst [vmem:[%s1836_s15 + $0x10] sm:$0xff] %v1878_v48  ;;  %v1882_v51 = vmax.f32 %v461_v49, 0.0  ;;  %v456_v52 = vadd.f32 %v1019_v35, %v455_v50 }
 0x155   : > { %v1144_v53 = vpop.f32.mrf.mxu0 }
 0x156   : > { %535 = vst [vmem:[%s1836_s15 + $0x28] sm:$0xff] %v1882_v51  ;;  %v1886_v54 = vmax.f32 %v456_v52, 0.0  ;;  %v471_v55 = vadd.f32 %v1144_v53, %v1019_v35 }
 0x157   : > { %v465_v56 = vpop.f32.mrf.mxu0 }
 0x158   : > { %534 = vst [vmem:[%s1836_s15 + $0x20] sm:$0xff] %v1886_v54  ;;  %v1890_v57 = vmax.f32 %v471_v55, 0.0  ;;  %v466_v58 = vadd.f32 %v1019_v35, %v465_v56 }
 0x159   : > { %v1147_v59 = vpop.f32.mrf.mxu0 }
 0x15a   : > { %537 = vst [vmem:[%s1836_s15 + $0x38] sm:$0xff] %v1890_v57  ;;  %v1894_v60 = vmax.f32 %v466_v58, 0.0  ;;  %v481_v61 = vadd.f32 %v1147_v59, %v1019_v35 }
 0x15b   : > { %v475_v62 = vpop.f32.mrf.mxu0 }
 0x15c   : > { %536 = vst [vmem:[%s1836_s15 + $0x30] sm:$0xff] %v1894_v60  ;;  %v1898_v63 = vmax.f32 %v481_v61, 0.0  ;;  %v476_v0 = vadd.f32 %v1019_v35, %v475_v62 }
 0x15d   : > { %v1150_v1 = vpop.f32.mrf.mxu0 }
 0x15e   : > { %539 = vst [vmem:[%s1836_s15 + $0x48] sm:$0xff] %v1898_v63  ;;  %v1902_v2 = vmax.f32 %v476_v0, 0.0  ;;  %v491_v3 = vadd.f32 %v1150_v1, %v1019_v35 }
 0x15f   : > { %v485_v4 = vpop.f32.mrf.mxu0 }
 0x160   : > { %538 = vst [vmem:[%s1836_s15 + $0x40] sm:$0xff] %v1902_v2  ;;  %v525_v5 = vmax.f32 %v491_v3, 0.0  ;;  %v486_v6 = vadd.f32 %v1019_v35, %v485_v4 }
 0x161   : > { %v1153_v7 = vpop.f32.mrf.mxu0 }
 0x162   : > { %541 = vst [vmem:[%s1836_s15 + $0x58] sm:$0xff] %v525_v5  ;;  %v524_v8 = vmax.f32 %v486_v6, 0.0  ;;  %v501_v9 = vadd.f32 %v1153_v7, %v1019_v35 }
 0x163   : > { %v495_v10 = vpop.f32.mrf.mxu0 }
 0x164   : > { %540 = vst [vmem:[%s1836_s15 + $0x50] sm:$0xff] %v524_v8  ;;  %v527_v11 = vmax.f32 %v501_v9, 0.0  ;;  %v496_v12 = vadd.f32 %v1019_v35, %v495_v10 }
 0x165   : > { %v1156_v13 = vpop.f32.mrf.mxu0 }
 0x166   : > { %543 = vst [vmem:[%s1836_s15 + $0x68] sm:$0xff] %v527_v11  ;;  %v526_v14 = vmax.f32 %v496_v12, 0.0  ;;  %v511_v15 = vadd.f32 %v1156_v13, %v1019_v35 }
 0x167   : > { %v505_v16 = vpop.f32.mrf.mxu0 }
 0x168   : > { %542 = vst [vmem:[%s1836_s15 + $0x60] sm:$0xff] %v526_v14  ;;  %v529_v17 = vmax.f32 %v511_v15, 0.0  ;;  %v506_v18 = vadd.f32 %v1019_v35, %v505_v16 }
 0x16a   : > { %545 = vst [vmem:[%s1836_s15 + $0x78] sm:$0xff] %v529_v17  ;;  %v528_v19 = vmax.f32 %v506_v18, 0.0  ;;  %1158 = vmatpush3.xpose.msra.mxu1 %v529_v17  ;;  %1193 = vmatpush3.msra.mxu0 %v529_v17 }
 0x16b   : > { %1194 = vmatprep.subr.mxu0 %v1616_v34  ;;  %1159 = vmatprep.subr.mxu1 %v1616_v34 }
 0x16c   : > { %544 = vst [vmem:[%s1836_s15 + $0x70] sm:$0xff] %v528_v19  ;;  %1195 = vmatpush3.msra.mxu0 %v528_v19 }
 0x16d   : > { %1196 = vmatprep.subr.mxu0 %v1616_v34 }
 0x16e   : > { %1160 = vmatpush3.xpose.msra.mxu1 %v528_v19  ;;  %1197 = vmatpush3.msra.mxu0 %v527_v11 }
 0x16f   : > { %1198 = vmatprep.subr.mxu0 %v1616_v34  ;;  %1161 = vmatprep.subr.mxu1 %v1616_v34 }
 0x170   : > { %1199 = vmatpush3.msra.mxu0 %v526_v14 }
 0x171   : > { %1200 = vmatprep.subr.mxu0 %v1616_v34 }
 0x172   : > { %1162 = vmatpush3.xpose.msra.mxu1 %v527_v11  ;;  %1201 = vmatpush3.msra.mxu0 %v525_v5 }
 0x173   : > { %1202 = vmatprep.subr.mxu0 %v1616_v34  ;;  %1163 = vmatprep.subr.mxu1 %v1616_v34 }
 0x174   : > { %1203 = vmatpush3.msra.mxu0 %v524_v8 }
 0x175   : > { %1204 = vmatprep.subr.mxu0 %v1616_v34 }
 0x176   : > { %1164 = vmatpush3.xpose.msra.mxu1 %v526_v14  ;;  %1205 = vmatpush3.msra.mxu0 %v1898_v63 }
 0x177   : > { %1206 = vmatprep.subr.mxu0 %v1616_v34  ;;  %1165 = vmatprep.subr.mxu1 %v1616_v34 }
 0x178   : > { %1207 = vmatpush3.msra.mxu0 %v1902_v2 }
 0x179   : > { %1208 = vmatprep.subr.mxu0 %v1616_v34 }
 0x17a   : > { %1166 = vmatpush3.xpose.msra.mxu1 %v525_v5  ;;  %1209 = vmatpush3.msra.mxu0 %v1890_v57 }
 0x17b   : > { %1210 = vmatprep.subr.mxu0 %v1616_v34  ;;  %1167 = vmatprep.subr.mxu1 %v1616_v34 }
 0x17c   : > { %1211 = vmatpush3.msra.mxu0 %v1894_v60 }
 0x17d   : > { %1212 = vmatprep.subr.mxu0 %v1616_v34 }
 0x17e   : > { %1168 = vmatpush3.xpose.msra.mxu1 %v524_v8  ;;  %1213 = vmatpush3.msra.mxu0 %v1882_v51 }
 0x17f   : > { %1214 = vmatprep.subr.mxu0 %v1616_v34  ;;  %1169 = vmatprep.subr.mxu1 %v1616_v34 }
 0x180   : > { %1215 = vmatpush3.msra.mxu0 %v1886_v54 }
 0x181   : > { %1216 = vmatprep.subr.mxu0 %v1616_v34 }
 0x182   : > { %1170 = vmatpush3.xpose.msra.mxu1 %v1898_v63  ;;  %1217 = vmatpush3.msra.mxu0 %v1874_v45 }
 0x183   : > { %1218 = vmatprep.subr.mxu0 %v1616_v34  ;;  %1171 = vmatprep.subr.mxu1 %v1616_v34 }
 0x184   : > { %1219 = vmatpush3.msra.mxu0 %v1878_v48 }
 0x185   : > { %1220 = vmatprep.subr.mxu0 %v1616_v34 }
 0x186   : > { %1172 = vmatpush3.xpose.msra.mxu1 %v1902_v2  ;;  %1221 = vmatpush3.msra.mxu0 %v1866_v39 }
 0x187   : > { %1222 = vmatprep.subr.mxu0 %v1616_v34  ;;  %1173 = vmatprep.subr.mxu1 %v1616_v34 }
 0x188   : > { %1223 = vmatpush3.msra.mxu0 %v1870_v42 }
 0x18a   : > { %1174 = vmatpush3.xpose.msra.mxu1 %v1890_v57 }
 0x18b   : > { %1175 = vmatprep.subr.mxu1 %v1616_v34 }
 0x18e   : > { %1176 = vmatpush3.xpose.msra.mxu1 %v1894_v60 }
 0x18f   : > { %1177 = vmatprep.subr.mxu1 %v1616_v34 }
 0x192   : > { %1178 = vmatpush3.xpose.msra.mxu1 %v1882_v51  ;;  %v653_v51 = vld [vmem:[#allocation4] sm:$0x1] }
 0x193   : > { %1179 = vmatprep.subr.mxu1 %v1616_v34 }
 0x196   : > { %1180 = vmatpush3.xpose.msra.mxu1 %v1886_v54 }
 0x197   : > { %1181 = vmatprep.subr.mxu1 %v1616_v34 }
 0x19a   : > { %1182 = vmatpush3.xpose.msra.mxu1 %v1874_v45  ;;  %v645_v45 = vld [vmem:[#allocation3] sm:$0x1] }
 0x19b   : > { %1183 = vmatprep.subr.mxu1 %v1616_v34 }
 0x19e   : > { %1184 = vmatpush3.xpose.msra.mxu1 %v1878_v48 }
 0x19f   : > { %1185 = vmatprep.subr.mxu1 %v1616_v34 }
 0x1a2   : > { %1186 = vmatpush3.xpose.msra.mxu1 %v1866_v39 }
 0x1a3   : > { %1187 = vmatprep.subr.mxu1 %v1616_v34  ;;  %v639_v34 = vshrl.u32 %v618_v21, 7 }
 0x1a5   : > { %v640_v35 = vsub.s32 0, %v639_v34 }
 0x1a6   : > { %1188 = vmatpush3.xpose.msra.mxu1 %v1870_v42 }
 0x1a9   : > { %1190 = vmatmul.mubr.f32.vlgmr.msra.gmra.mxu1 %v546_v20 }
 0x269   : > { %v613_v25 = vpop.f32.mrf.mxu1 }
 0x26a   : > { %v623_v26 = vsel %vm622_vm2, %v613_v25, -1e+30 }
 0x26b   : > { %v1191_v27 = vpop.f32.mrf.mxu1  ;;  %v626_v28 = vsel %vm625_vm3, %v623_v26, -inf }
 0x26c   : > { %627 = vmax.xlane.f32.xlu0 %v626_v28 }
 0x2f5   : > { %v628_v31 = vpop.xlane.xlu0 %627 }
 0x2f6   : > { %v629_v32 = vmax.f32 %v624_v30, %v628_v31 }
 0x2f8   : > { %v630_v33 = vsub.f32 %v624_v30, %v629_v32  ;;  %736 = vst.msk [vmem:[#allocation2] sm:$0x1] %vm651_vm4, %v629_v32  ;;  %738 = vst.msk [vmem:[%s737_s18] sm:$0x1] %vm651_vm4, %v629_v32  ;;  %635 = vperm.xlu0 %1360, %v629_v32  }
 0x2fa   : > { %v631_v42 = vmul.f32 1.442695, %v630_v33 }
 0x373   : > { %v636_v36 = vpop.permute.xlu0 %635 }
 0x374   : > { %v641_v37 = vrot.slane %v636_v36, %v640_v35 }
 0x376   : > { %v642_v38 = vsub.f32 %v623_v26, %v641_v37 }
 0x378   : > { %v643_v39 = vmul.f32 1.442695, %v642_v38 }
 0x37a   : > { %1362 = vpow2.f32 %v643_v39 }
 0x37b   : > { %1364 = vpow2.f32 %v631_v42 }
 0x387   : > { %v1363_v41 = vpop.eup %1362 }
 0x388   : > { %746 = vst.msk [vmem:[%s741_s17] sm:$0x1] %vm1971_vm5, %v1363_v41  ;;  %1225 = vmatmul.mubr.f32.vlgmr.msra.gmra.mxu0 %v1363_v41  ;;  %v647_v43 = vsel %vm625_vm3, %v1363_v41, 0.0  ;;  %v1365_v44 = vpop.eup %1364 }
 0x389   : > { %648 = vadd.xlane.f32.xlu1 %v647_v43  ;;  %v646_v46 = vmul.f32 %v1365_v44, %v645_v45 }
 0x39a   : > { %656 = vperm.xlu1 %1361, %v1365_v44  }
 0x412   : > { %v649_v47 = vpop.xlane.xlu1 %648 }
 0x413   : > { %v650_v48 = vadd.f32 %v649_v47, %v646_v46 }
 0x415   : > { %652 = vst.msk [vmem:[#allocation3] sm:$0x1] %vm651_vm4, %v650_v48 }
 0x416   : > { %v657_v49 = vpop.permute.xlu1 %656 }
 0x417   : > { %v662_v50 = vrot.slane %v657_v49, %v640_v35 }
 0x419   : > { %v663_v52 = vmul.f32 %v662_v50, %v653_v51 }
 0x447   : > { %750 = sbr.rel (%p1021_p1) target bundleno = 1250 (0x4e2), region = 52 }
 0x448   : > { %v730_v53 = vpop.f32.mrf.mxu0 }
 0x449   : > { %v734_v54 = vadd.f32 %v730_v53, %v663_v52 }
 0x44a   : > { %v1226_v55 = vpop.f32.mrf.mxu0 }
 0x44b   : > { %735 = vst [vmem:[#allocation4] sm:$0x1] %v734_v54 }
 0x44c   : > { %v751_v56 = vld [vmem:[#allocation3] sm:$0x1]  ;;  %v753_v57 = vld [vmem:[#allocation2] sm:$0x1]  ;;  %v1619_v58 = vmov 0  }
 0x44d   : > { %1366 = vset.pattern.permute.xlu0 %v1619_v58  ;;  %1368 = vrcp.f32 %v751_v56  ;;  %1367 = vset.pattern.permute.xlu1 %v1619_v58  ;;  %v754_v59 = vld [vmem:[#allocation5] sm:$0x1]  ;;  %v767_v60 = vld [vmem:[#allocation5 + $0x1] sm:$0x1]  ;;  %v1022_v10 = vld [vmem:[%s1838_s1 + $0x1] sm:$0x1] }
 0x44e   : > { %v755_v61 = vsub.f32 %v754_v59, %v753_v57  ;;  %v768_v62 = vsub.f32 %v767_v60, %v753_v57  ;;  %v759_v11 = vld [vmem:[%s1838_s1] sm:$0x1] }
 0x450   : > { %v769_v63 = vmul.f32 1.442695, %v768_v62  ;;  %v756_v0 = vmul.f32 1.442695, %v755_v61 }
 0x452   : > { %1370 = vpow2.f32 %v769_v63  ;;  %v781_v6 = vld [vmem:[#allocation4] sm:$0x1] }
 0x453   : > { %1372 = vpow2.f32 %v756_v0 }
 0x45a   : > { %v1369_v1 = vpop.eup %1368 }
 0x45b   : > { %784 = vperm.xlu0 %1366, %v1369_v1  }
 0x45f   : > { %v1371_v2 = vpop.eup %1370 }
 0x460   : > { %v1373_v3 = vpop.eup %1372  ;;  %v771_v4 = vmul.f32 %v1371_v2, %v1369_v1 }
 0x461   : > { %v758_v5 = vmul.f32 %v1373_v3, %v1369_v1 }
 0x462   : > { %776 = vperm.xlu1 %1367, %v771_v4  }
 0x463   : > { %762 = vperm.xlu0 %1366, %v758_v5  }
 0x4d6   : > { %v785_v7 = vpop.permute.xlu0 %784 }
 0x4d7   : > { %v790_v8 = vrot.slane %v785_v7, %v640_v35 }
 0x4d9   : > { %v791_v9 = vmul.f32 %v790_v8, %v781_v6 }
 0x4db   : > { %792 = vst [vmem:[%s1840_s12] sm:$0x1] %v791_v9 }
 0x4dd   : > { %v777_v12 = vpop.permute.xlu1 %776 }
 0x4de   : > { %v779_v13 = vmul.f32 %v1022_v10, %v777_v12  ;;  %v763_v14 = vpop.permute.xlu0 %762 }
 0x4df   : > { %v765_v15 = vmul.f32 %v763_v14, %v759_v11 }
 0x4e0   : > { %1023 = vst.msk [vmem:[%s1838_s1 + $0x1] sm:$0x1] %vm1971_vm5, %v779_v13 }
 0x4e1   : > { %766 = vst.msk [vmem:[%s1838_s1] sm:$0x1] %vm1971_vm5, %v765_v15 }
 0x4e2 PF: > { %s2171_s16 = sld [smem:[#allocation20_spill]]  ;;  %s798_s3 = sand.u32 1, %s1714_s8  }
 0x4e3   : > { %s2172_s14 = sld [smem:[#allocation24_spill]]  ;;  %s1026_s5 = sshll.u32 %s1592_s27, 4 }
 0x4e4   : > { %s2173_s13 = sld [smem:[#allocation34_spill]]  ;;  %s835_s28 = sshll.u32 %s1838_s1, 4  ;;  %s836_s28 = int_to_ptr.vmem [resolvable:$true] %s835_s28 }
 0x4e5   : > { %s2174_s2 = sld [smem:[#allocation33_spill]]  ;;  %s2003_s30 = scalar_lea.sflag [#allocation13], %s798_s3 }
 0x4e6   : > { %s1428_s29 = scalar_lea.vmem %s836_s28, 32  ;;  %s1620_s27 = smov [#allocation12]  }
 0x4e7   : > { %p1429_p4 = scmp.ne.s32.totalorder %s836_s28, %s1428_s29  ;;  %s1432_s8 = sshll.u32 %s1620_s27, 4  ;;  %s1433_s8 = int_to_ptr.vmem [resolvable:$false] %s1432_s8 }
 0x4e8   : > { %s1027_s10 = sshll.u32 %s2171_s16, 5  ;;  %p1435_p5 = scmp.lt.s32.totalorder %s836_s28, %s1433_s8 }
 0x4e9   : > { %s815_s20 = sadd.s32 %s1027_s10, %s1026_s5  ;;  %p2175_p7 = scmp.ne.s32.totalorder %s2172_s14, 0 }
 0x4ea   : > { %s1995_s19 = scalar_lea.hbm %s2173_s13, %s1027_s10  ;;  %s1028_s18 = sshll.u32 %s815_s20, 7 }
 0x4eb   : > { %s2001_s9 = scalar_lea.hbm %s2174_s2, %s1028_s18  ;;  %p1430_p8 = pnand %p1429_p4, %p2175_p7 }
 0x4ec   : > { %s1434_s5 = scalar_lea.vmem %s1433_s8, 64 }
 0x4ed   : > { %p1431_p2 = pneg %p1430_p8  ;;  %p1436_p9 = scmp.lt.s32.totalorder %s1434_s5, %s1428_s29 }
 0x4ef   : > { %p1437_p11 = por %p1436_p9, %p1435_p5 }
 0x4f1   : > { %p1438_p10 = pnand %p1437_p11, %p1431_p2 }
 0x4f3   : > { %1441 = shalt.err (!%p1438_p10)
}
 0x4f4   : > { %s1442_s0 = scalar_lea.hbm %s1995_s19, 32  ;;  %s1446_s10 = scalar_lea.hbm %s2173_s13, 64 }
 0x4f5   : > { %p1443_p13 = scmp.ne.s32.totalorder %s1995_s19, %s1442_s0  ;;  %p1447_p12 = scmp.lt.s32.totalorder %s1995_s19, %s2173_s13 }
 0x4f6   : > { %p1448_p1 = scmp.lt.s32.totalorder %s1446_s10, %s1442_s0 }
 0x4f7   : > { %p1444_p6 = pnand %p1443_p13, %p2175_p7 }
 0x4f8   : > { %p1449_p4 = por %p1448_p1, %p1447_p12 }
 0x4f9   : > { %p1445_p3 = pneg %p1444_p6 }
 0x4fb   : > { %p1450_p8 = pnand %p1449_p4, %p1445_p3 }
 0x4fd   : > { %1453 = shalt.err (!%p1450_p8)
}
 0x4fe   : > { %1234 = dma.vmem_to_hbm [thread:$0]  (%p2175_p7), %s836_s28, 32, %s1995_s19, %s2003_s30  }
 0x4ff   : > { %s818_s4 = sshll.u32 %s1836_s15, 4  ;;  %s1031_s18 = sshll.u32 %s2171_s16, 4  ;;  %s2023_s4 = int_to_ptr.vmem [resolvable:$true] %s818_s4 }
 0x500   : > { %s794_s17 = scalar_lea.sflag [#allocation8], %s1821_s21  ;;  %s1454_s27 = scalar_lea.vmem %s2023_s4, 2048 }
 0x501   : > { %p1455_p2 = scmp.ne.s32.totalorder %s2023_s4, %s1454_s27  ;;  %s1621_s8 = smov [#allocation11]  }
 0x502   : > { %s1458_s5 = sshll.u32 %s1621_s8, 4  ;;  %s1459_s5 = int_to_ptr.vmem [resolvable:$false] %s1458_s5 }
 0x503   : > { %p1456_p5 = pnand %p1455_p2, %p1780_p0  ;;  %s1460_s0 = scalar_lea.vmem %s1459_s5, 4096 }
 0x504   : > { %p1461_p11 = scmp.lt.s32.totalorder %s2023_s4, %s1459_s5  ;;  %p1462_p10 = scmp.lt.s32.totalorder %s1460_s0, %s1454_s27 }
 0x505   : > { %p1457_p9 = pneg %p1456_p5 }
 0x506   : > { %p1463_p13 = por %p1462_p10, %p1461_p11 }
 0x508   : > { %p1464_p6 = pnand %p1463_p13, %p1457_p9 }
 0x50a   : > { %1467 = shalt.err (!%p1464_p6)
}
 0x50b   : > { %s1468_s15 = scalar_lea.hbm %s2001_s9, 2048  ;;  %s1472_s1 = scalar_lea.hbm %s2174_s2, 8192 }
 0x50c   : > { %p1469_p3 = scmp.ne.s32.totalorder %s2001_s9, %s1468_s15  ;;  %p1473_p4 = scmp.lt.s32.totalorder %s2001_s9, %s2174_s2 }
 0x50d   : > { %p1474_p8 = scmp.lt.s32.totalorder %s1472_s1, %s1468_s15 }
 0x50e   : > { %p1470_p12 = pnand %p1469_p3, %p1780_p0 }
 0x50f   : > { %p1475_p2 = por %p1474_p8, %p1473_p4 }
 0x510   : > { %p1471_p1 = pneg %p1470_p12 }
 0x512   : > { %p1476_p5 = pnand %p1475_p2, %p1471_p1 }
 0x514   : > { %1479 = shalt.err (!%p1476_p5)
}
 0x515   : > { %s1622_s20 = smov 128   ;;  %s1623_s11 = smov 8  }
 0x516   : > { %1233 = dma.vmem_to_hbm [thread:$0]  (%p1780_p0), %s2023_s4, 2048, %s2001_s9, %s794_s17, %s1622_s20, %s1622_s20, %s1623_s11  }
 0x517   : > { %s2177_s5 = sld [smem:[#allocation35_spill]]  ;;  %s848_s15 = sshll.u32 %s1840_s12, 4  ;;  %s849_s15 = int_to_ptr.vmem [resolvable:$true] %s848_s15 }
 0x518   : > { %s1480_s19 = scalar_lea.vmem %s849_s15, 16  ;;  %s1624_s28 = smov [#allocation14]  }
 0x519   : > { %p1481_p9 = scmp.ne.s32.totalorder %s849_s15, %s1480_s19  ;;  %s1484_s1 = sshll.u32 %s1624_s28, 4  ;;  %s1485_s1 = int_to_ptr.vmem [resolvable:$false] %s1484_s1 }
 0x51a   : > { %s1486_s3 = scalar_lea.vmem %s1485_s1, 32  ;;  %p1487_p13 = scmp.lt.s32.totalorder %s849_s15, %s1485_s1 }
 0x51b   : > { %p1482_p11 = pnand %p1481_p9, %p2175_p7  ;;  %p1488_p6 = scmp.lt.s32.totalorder %s1486_s3, %s1480_s19 }
 0x51d   : > { %s846_s0 = scalar_lea.hbm %s2177_s5, %s1031_s18  ;;  %p1483_p10 = pneg %p1482_p11 }
 0x51e   : > { %p1489_p3 = por %p1488_p6, %p1487_p13 }
 0x520   : > { %p1490_p0 = pnand %p1489_p3, %p1483_p10 }
 0x522   : > { %1493 = shalt.err (!%p1490_p0)
}
 0x523   : > { %s1494_s9 = scalar_lea.hbm %s846_s0, 16  ;;  %s1498_s16 = scalar_lea.hbm %s2177_s5, 32 }
 0x524   : > { %p1495_p12 = scmp.ne.s32.totalorder %s846_s0, %s1494_s9  ;;  %p1499_p8 = scmp.lt.s32.totalorder %s846_s0, %s2177_s5 }
 0x525   : > { %p1500_p2 = scmp.lt.s32.totalorder %s1498_s16, %s1494_s9 }
 0x526   : > { %p1496_p1 = pnand %p1495_p12, %p2175_p7 }
 0x527   : > { %p1501_p5 = por %p1500_p2, %p1499_p8 }
 0x528   : > { %p1497_p4 = pneg %p1496_p1 }
 0x52a   : > { %p1502_p9 = pnand %p1501_p5, %p1497_p4 }
 0x52c   : > { %1505 = shalt.err (!%p1502_p9)
}
 0x52d   : > { %1235 = dma.vmem_to_hbm [thread:$0]  (%p2175_p7), %s849_s15, 16, %s846_s0, %s2003_s30  }
 0x52e PF: > { %s2178_s18 = sld [smem:[#allocation19_spill]]  ;;  %p1260_p11 = scmp.ge.s32.totalorder %s1608_s7, 2 }
 0x52f   : > { %s2179_s17 = sld [smem:[#allocation23_spill]] }
 0x534   : > { %s860_s10 = sand.u32 1, %s2178_s18  }
 0x535   : > { %p2180_p10 = scmp.ne.s32.totalorder %s2179_s17, 0  ;;  %s861_s20 = scalar_lea.sflag [#allocation8], %s860_s10 }
 0x537   : > { %p1248_p13 = pnand %p1260_p11, %p2180_p10 }
 0x539   : > { %p1249_p6 = pneg %p1248_p13 }
 0x53b   : > { %1559 = dma.done.wait (%p1249_p6), %s861_s20, 2048  }
 0x53c   : > { %1561 = vsyncadd (%p1249_p6), %s861_s20, 4294965248  ;;  %s2181_s11 = sadd.s32 4294967294, %s1608_s7   ;;  %s2182_s27 = sld [smem:[#allocation25_spill]] }
 0x53d   : > { %s869_s8 = sand.u32 1, %s2181_s11  }
 0x53e   : > { %s870_s30 = scalar_lea.sflag [#allocation13], %s869_s8 }
 0x542   : > { %p2183_p3 = scmp.ne.s32.totalorder %s2182_s27, 0 }
 0x544   : > { %p1251_p0 = pnand %p1260_p11, %p2183_p3 }
 0x546   : > { %p1252_p12 = pneg %p1251_p0 }
 0x548   : > { %1563 = dma.done.wait (%p1252_p12), %s870_s30, 48  }
 0x549   : > { %1565 = vsyncadd (%p1252_p12), %s870_s30, 4294967248  ;;  %s27_s7 = sadd.s32 1, %s1608_s7   ;;  %s2184_s27 = sld [smem:[#allocation21_spill]] }
 0x54a   : > { %p24_p7 = scmp.ge.s32.totalorder %s27_s7, 6   ;;  %s2185_s28 = sld [smem:[#allocation22_spill]] }
 0x54b   : > { %s2186_s29 = sld [smem:[#allocation26_spill]]  ;;  %s2188_s21 = smov %s1572_s22 }
 0x54c   : > { %s2187_s30 = sld [smem:[#allocation28_spill]]  ;;  %s2189_s22 = smov %s1576_s23 }
 0x54d   : > { %s2190_s23 = smov %s1794_s24  ;;  %s2191_s24 = smov %s1584_s25 }
 0x54e   : > { %s2192_s25 = smov %s1588_s26  ;;  %s2193_s26 = smov %s1797_s6 }
 0x54f   :  { %26 = sbr.rel (!%p24_p7) target bundleno = 20 (0x14), region = 128 }
 0x554   :  { %883 = vsyncpa [#allocation7], 1 }
 0x555   :  { %885 = vsyncpa [#allocation7 + $0x1], 1 }
 0x556   :  { %886 = vsyncpa [#allocation10], 1 }
 0x557   :  { %887 = vsyncpa [#allocation8], 1 }
 0x558   :  { %889 = vsyncpa [#allocation8 + $0x1], 1 }
 0x559   :  { %890 = vsyncpa [#allocation13], 1 }
 0x55a   :  { %892 = vsyncpa [#allocation13 + $0x1], 1 }

</bundles_post_ra>
